<compile_context>
chip_gen: v7x
topology: tpu7x:2x2x1
jax: 0.10.0
libtpu: 0.0.40
codegen_flags: <defaults>
</compile_context>

<pallas_src>
import functools

import jax
import jax.numpy as jnp
from jax.experimental import pallas as pl
from jax.experimental.pallas import tpu as pltpu

LANES = 1024       # lane-dense slab width (multiple of 128) -> unmasked vst rows
TILE_R = 1024      # max rows per block (multiple of 8) -> 4 MiB f32 block
MIN_STEPS = 4      # target minimum number of grid steps for pipelining


def _envelope_kernel(x_ref, o_ref, *, p, a, b, c):
    x = x_ref[...]
    # a*x^(p-1) + b*x^p + c*x^(p+1) == x^(p-1) * (a + x*(b + c*x))   (Horner)
    xp = x ** (p - 1)                     # static integer power -> repeated squaring
    poly = a + x * (b + c * x)
    # Exact reciprocal (EUP vrcp + refinement); see header note on the v7x-only
    # approx+Newton micro-opt that was deliberately not taken.
    o_ref[...] = pl.reciprocal(x, approx=False) + xp * poly


def _sublane_multiple(dtype):
    return {4: 8, 2: 16, 1: 32}.get(jnp.dtype(dtype).itemsize, 8)


def _pick_tile_r(rows, sub):
    """Rows per block: as large as possible while keeping >= MIN_STEPS grid steps."""
    if rows <= sub:
        return rows                       # single block; full-dim blocks are legal
    t = pl.cdiv(rows, MIN_STEPS)          # aim for ~MIN_STEPS steps
    t = pl.cdiv(t, sub) * sub             # keep sublane dim a multiple of 8/16/32
    return max(sub, min(TILE_R, t))


def _envelope_2d(x2d, *, p, a, b, c):
    """Runs the envelope kernel over a (rows, LANES) lane-dense slab."""
    rows, lanes = x2d.shape
    tile_r = _pick_tile_r(rows, _sublane_multiple(x2d.dtype))
    kernel = functools.partial(_envelope_kernel, p=p, a=a, b=b, c=c)
    return pl.pallas_call(
        kernel,
        out_shape=jax.ShapeDtypeStruct((rows, lanes), x2d.dtype),
        grid_spec=pltpu.PrefetchScalarGridSpec(
            num_scalar_prefetch=0,
            grid=(pl.cdiv(rows, tile_r),),
            in_specs=[pl.BlockSpec((tile_r, lanes), lambda i: (i, 0))],
            out_specs=pl.BlockSpec((tile_r, lanes), lambda i: (i, 0)),
        ),
        compiler_params=pltpu.CompilerParams(
            dimension_semantics=("parallel",),   # shards the stream across TCs on v7x
            vmem_limit_bytes=32 * 1024 * 1024,   # 16 MiB of buffers + headroom
        ),
    )(x2d)


def envelope_pallas(x, exponent):
    """Applies the DimeNet envelope elementwise to `x` (any shape)."""
    p = exponent + 1
    a = -(p + 1) * (p + 2) / 2.0
    b = float(p * (p + 2))
    c = -p * (p + 1) / 2.0

    orig_shape = x.shape
    flat = x.reshape(-1)
    n = flat.shape[0]
    if n == 0:
        return x                           # empty-input guard

    n_tail = n % LANES
    n_bulk = n - n_tail

    pieces = []
    if n_bulk:
        bulk = flat if n_tail == 0 else flat[:n_bulk]
        bulk2d = bulk.reshape(n_bulk // LANES, LANES)
        pieces.append(_envelope_2d(bulk2d, p=p, a=a, b=b, c=c).reshape(-1))
    if n_tail:
        # Only the (<1024-element) tail is padded -- the big array is never run
        # through jnp.pad.  Pad value 1.0 keeps 1/x finite; padded lanes dropped.
        tail = jnp.pad(flat[n_bulk:], (0, LANES - n_tail), constant_values=1.0)
        tail_out = _envelope_2d(tail.reshape(1, LANES), p=p, a=a, b=b, c=c)
        pieces.append(tail_out.reshape(-1)[:n_tail])

    out = pieces[0] if len(pieces) == 1 else jnp.concatenate(pieces)
    return out.reshape(orig_shape)


def envelope_ref(x, exponent):
    """Pure-JAX reference matching the PyTorch module exactly."""
    p = exponent + 1
    a = -(p + 1) * (p + 2) / 2.0
    b = float(p * (p + 2))
    c = -p * (p + 1) / 2.0
    x_pow_p0 = x ** (p - 1)
    x_pow_p1 = x_pow_p0 * x
    x_pow_p2 = x_pow_p1 * x
    return 1.0 / x + a * x_pow_p0 + b * x_pow_p1 + c * x_pow_p2


if __name__ == "__main__":
    key = jax.random.PRNGKey(0)
    exponent = 5  # DimeNet default envelope_exponent

    k1, k2, k3 = jax.random.split(key, 3)
    # x = scaled edge distances in (0, 1], as produced upstream in DimeNet.
    x_aligned = jax.random.uniform(k1, (8192,), dtype=jnp.float32,
                                   minval=0.05, maxval=1.0)     # no-pad fast path
    x_mid = jax.random.uniform(k2, (40, 1024), dtype=jnp.float32,
                               minval=0.05, maxval=1.0)         # multi-step grid,
                                                                # ragged last block
    x_ragged = jax.random.uniform(k3, (2, 1000), dtype=jnp.float32,
                                  minval=0.05, maxval=1.0)      # bulk + tiny tail
    x_empty = jnp.zeros((0,), jnp.float32)                      # empty-input guard

    env = jax.jit(envelope_pallas, static_argnums=1)
    for x in (x_aligned, x_mid, x_ragged, x_empty):
        out = jax.block_until_ready(env(x, exponent))
        ref = envelope_ref(x, exponent)
        assert out.shape == x.shape and out.dtype == x.dtype
        assert jnp.allclose(out, ref, rtol=1e-5, atol=1e-5), "mismatch vs reference"

    print("KERNEL_OK")
</pallas_src>

<mosaic_0001>
module attributes {stable_mosaic.version = 11 : i64} {
  func.func @_envelope_kernel(%arg0: i32, %arg1: memref<8x1024xf32, #tpu.memory_space<vmem>>, %arg2: memref<8x1024xf32, #tpu.memory_space<vmem>>) attributes {dimension_semantics = [#tpu.dimension_semantics<parallel>], iteration_bounds = array<i64: 1>, scalar_prefetch = 0 : i64, scratch_operands = 0 : i64, tpu.core_type = #tpu.core_type<tc>, window_params = [{transform_indices = @transform_0, window_bounds = array<i64: 8, 1024>}, {transform_indices = @transform_1, window_bounds = array<i64: 8, 1024>}]} {
    %c0 = arith.constant 0 : index
    %c0_0 = arith.constant 0 : index
    %0 = vector.load %arg1[%c0, %c0_0] : memref<8x1024xf32, #tpu.memory_space<vmem>>, vector<8x1024xf32>
    %1 = arith.mulf %0, %0 : vector<8x1024xf32>
    %2 = arith.mulf %1, %1 : vector<8x1024xf32>
    %3 = arith.mulf %0, %2 : vector<8x1024xf32>
    %cst = arith.constant -2.100000e+01 : f32
    %4 = vector.broadcast %cst : f32 to vector<8x1024xf32>
    %5 = arith.mulf %4, %0 : vector<8x1024xf32>
    %cst_1 = arith.constant 4.800000e+01 : f32
    %6 = vector.broadcast %cst_1 : f32 to vector<8x1024xf32>
    %7 = arith.addf %6, %5 : vector<8x1024xf32>
    %8 = arith.mulf %0, %7 : vector<8x1024xf32>
    %cst_2 = arith.constant -2.800000e+01 : f32
    %9 = vector.broadcast %cst_2 : f32 to vector<8x1024xf32>
    %10 = arith.addf %9, %8 : vector<8x1024xf32>
    %11 = tpu.reciprocal %0 : vector<8x1024xf32> -> vector<8x1024xf32>
    %12 = arith.mulf %3, %10 : vector<8x1024xf32>
    %13 = arith.addf %11, %12 : vector<8x1024xf32>
    %c0_3 = arith.constant 0 : index
    %c0_4 = arith.constant 0 : index
    %14 = vector.load %arg2[%c0_3, %c0_4] : memref<8x1024xf32, #tpu.memory_space<vmem>>, vector<8x1024xf32>
    tpu.vector_store %arg2[%c0_3, %c0_4], %13 {strides = array<i32>} : memref<8x1024xf32, #tpu.memory_space<vmem>>, vector<8x1024xf32>,
    return
  }
  func.func @transform_0(%arg0: i32) -> (i32, i32) {
    %c0_i32 = arith.constant 0 : i32
    %c0_i32_0 = arith.constant 0 : i32
    return %arg0, %c0_i32 : i32, i32
  }
  func.func @transform_1(%arg0: i32) -> (i32, i32) {
    %c0_i32 = arith.constant 0 : i32
    %c0_i32_0 = arith.constant 0 : i32
    return %arg0, %c0_i32 : i32, i32
  }
}

</mosaic_0001>

<bundles_post_ra>
// kernel: envelope_pallas.1
= control target key start
LH: loop header
LB: loop body
LE: loop exit
PB: predicated region body
PF: predicated region fallthrough
CT: control target
= control target key end

     0   :  { %s182_s0 = inlined_call_operand.vmem [shape: f32[8,1024], index: 0, kind: input, shape index: {}]   ;;  %s183_s1 = inlined_call_operand.vmem [shape: f32[8,1024], index: 1, kind: output, shape index: {}]  }
   0x1   :  { %v8_v0 = vld [vmem:[%s182_s0] sm:$0xff]  ;;  %v9_v1 = vld [vmem:[%s182_s0 + $0x8] sm:$0xff]  ;;  %v10_v2 = vld [vmem:[%s182_s0 + $0x10] sm:$0xff] }
   0x2   :  { %v16_v3 = vmul.f32 %v8_v0, %v8_v0  ;;  %v40_v4 = vmul.f32 -21.0, %v8_v0  ;;  %108 = vrcp.f32 %v8_v0  ;;  %v17_v5 = vmul.f32 %v9_v1, %v9_v1  ;;  %v11_v9 = vld [vmem:[%s182_s0 + $0x18] sm:$0xff]  ;;  %v12_v21 = vld [vmem:[%s182_s0 + $0x20] sm:$0xff]  ;;  %v13_v33 = vld [vmem:[%s182_s0 + $0x28] sm:$0xff] }
   0x3   :  { %v41_v6 = vmul.f32 -21.0, %v9_v1  ;;  %110 = vrcp.f32 %v9_v1  ;;  %v18_v7 = vmul.f32 %v10_v2, %v10_v2  ;;  %v42_v8 = vmul.f32 -21.0, %v10_v2  ;;  %v14_v41 = vld [vmem:[%s182_s0 + $0x30] sm:$0xff]  ;;  %v15_v56 = vld [vmem:[%s182_s0 + $0x38] sm:$0xff] }
   0x4   :  { %v24_v10 = vmul.f32 %v16_v3, %v16_v3  ;;  %v48_v11 = vadd.f32 48.0, %v40_v4  ;;  %v25_v12 = vmul.f32 %v17_v5, %v17_v5  ;;  %112 = vrcp.f32 %v10_v2 }
   0x5   :  { %v49_v13 = vadd.f32 48.0, %v41_v6  ;;  %v26_v14 = vmul.f32 %v18_v7, %v18_v7  ;;  %v50_v15 = vadd.f32 48.0, %v42_v8  ;;  %v19_v16 = vmul.f32 %v11_v9, %v11_v9 }
   0x6   :  { %v32_v17 = vmul.f32 %v24_v10, %v8_v0  ;;  %v56_v18 = vmul.f32 %v48_v11, %v8_v0  ;;  %v33_v19 = vmul.f32 %v25_v12, %v9_v1  ;;  %v43_v20 = vmul.f32 -21.0, %v11_v9 }
   0x7   :  { %v57_v22 = vmul.f32 %v49_v13, %v9_v1  ;;  %v34_v23 = vmul.f32 %v26_v14, %v10_v2  ;;  %v58_v24 = vmul.f32 %v50_v15, %v10_v2  ;;  %v27_v25 = vmul.f32 %v19_v16, %v19_v16 }
   0x8   :  { %v64_v26 = vadd.f32 -28.0, %v56_v18  ;;  %v51_v27 = vadd.f32 48.0, %v43_v20  ;;  %114 = vrcp.f32 %v11_v9  ;;  %v20_v28 = vmul.f32 %v12_v21, %v12_v21 }
   0x9   :  { %v65_v29 = vadd.f32 -28.0, %v57_v22  ;;  %v66_v30 = vadd.f32 -28.0, %v58_v24  ;;  %v35_v31 = vmul.f32 %v27_v25, %v11_v9  ;;  %v44_v32 = vmul.f32 -21.0, %v12_v21 }
   0xa   :  { %v80_v34 = vmul.f32 %v64_v26, %v32_v17  ;;  %v59_v35 = vmul.f32 %v51_v27, %v11_v9  ;;  %v28_v36 = vmul.f32 %v20_v28, %v20_v28  ;;  %116 = vrcp.f32 %v12_v21 }
   0xb   :  { %v81_v37 = vmul.f32 %v65_v29, %v33_v19  ;;  %v82_v38 = vmul.f32 %v66_v30, %v34_v23  ;;  %v52_v39 = vadd.f32 48.0, %v44_v32  ;;  %v21_v40 = vmul.f32 %v13_v33, %v13_v33 }
   0xc   :  { %v109_v42 = vpop.eup %108  ;;  %v67_v43 = vadd.f32 -28.0, %v59_v35  ;;  %v36_v44 = vmul.f32 %v28_v36, %v12_v21  ;;  %v45_v45 = vmul.f32 -21.0, %v13_v33  ;;  %118 = vrcp.f32 %v13_v33 }
   0xd   :  { %v111_v46 = vpop.eup %110  ;;  %v88_v47 = vadd.f32 %v109_v42, %v80_v34  ;;  %v60_v48 = vmul.f32 %v52_v39, %v12_v21  ;;  %v29_v49 = vmul.f32 %v21_v40, %v21_v40  ;;  %v22_v50 = vmul.f32 %v14_v41, %v14_v41 }
   0xe   :  { %v113_v51 = vpop.eup %112  ;;  %v89_v52 = vadd.f32 %v111_v46, %v81_v37  ;;  %v83_v53 = vmul.f32 %v67_v43, %v35_v31  ;;  %v53_v54 = vadd.f32 48.0, %v45_v45  ;;  %v46_v55 = vmul.f32 -21.0, %v14_v41 }
   0xf   :  { %96 = vst [vmem:[%s183_s1] sm:$0xff] %v88_v47  ;;  %v90_v57 = vadd.f32 %v113_v51, %v82_v38  ;;  %v68_v58 = vadd.f32 -28.0, %v60_v48  ;;  %v37_v59 = vmul.f32 %v29_v49, %v13_v33  ;;  %v30_v60 = vmul.f32 %v22_v50, %v22_v50 }
  0x10   :  { %97 = vst [vmem:[%s183_s1 + $0x8] sm:$0xff] %v89_v52  ;;  %v61_v61 = vmul.f32 %v53_v54, %v13_v33  ;;  %v54_v62 = vadd.f32 48.0, %v46_v55  ;;  %120 = vrcp.f32 %v14_v41  ;;  %v23_v63 = vmul.f32 %v15_v56, %v15_v56 }
  0x11   :  { %98 = vst [vmem:[%s183_s1 + $0x10] sm:$0xff] %v90_v57  ;;  %v84_v0 = vmul.f32 %v68_v58, %v36_v44  ;;  %v47_v1 = vmul.f32 -21.0, %v15_v56  ;;  %122 = vrcp.f32 %v15_v56  ;;  %v38_v7 = vmul.f32 %v30_v60, %v14_v41 }
  0x12   :  { %v115_v2 = vpop.eup %114  ;;  %v69_v3 = vadd.f32 -28.0, %v61_v61  ;;  %v62_v4 = vmul.f32 %v54_v62, %v14_v41  ;;  %v31_v5 = vmul.f32 %v23_v63, %v23_v63 }
  0x13   :  { %v91_v6 = vadd.f32 %v115_v2, %v83_v53  ;;  %v55_v8 = vadd.f32 48.0, %v47_v1 }
  0x14   :  { %v117_v9 = vpop.eup %116  ;;  %v85_v10 = vmul.f32 %v69_v3, %v37_v59  ;;  %v70_v11 = vadd.f32 -28.0, %v62_v4  ;;  %v39_v13 = vmul.f32 %v31_v5, %v15_v56 }
  0x15   :  { %99 = vst [vmem:[%s183_s1 + $0x18] sm:$0xff] %v91_v6  ;;  %v92_v12 = vadd.f32 %v117_v9, %v84_v0  ;;  %v63_v14 = vmul.f32 %v55_v8, %v15_v56 }
  0x16   :  { %v119_v15 = vpop.eup %118  ;;  %v86_v17 = vmul.f32 %v70_v11, %v38_v7 }
  0x17   :  { %100 = vst [vmem:[%s183_s1 + $0x20] sm:$0xff] %v92_v12  ;;  %v93_v16 = vadd.f32 %v119_v15, %v85_v10  ;;  %v71_v18 = vadd.f32 -28.0, %v63_v14 }
  0x19   :  { %101 = vst [vmem:[%s183_s1 + $0x28] sm:$0xff] %v93_v16  ;;  %v87_v19 = vmul.f32 %v71_v18, %v39_v13 }
  0x1a   :  { %v121_v20 = vpop.eup %120 }
  0x1b   :  { %v123_v21 = vpop.eup %122  ;;  %v94_v22 = vadd.f32 %v121_v20, %v86_v17 }
  0x1c   :  { %v95_v23 = vadd.f32 %v123_v21, %v87_v19 }
  0x1d   :  { %102 = vst [vmem:[%s183_s1 + $0x30] sm:$0xff] %v94_v22 }
  0x1e   :  { %103 = vst [vmem:[%s183_s1 + $0x38] sm:$0xff] %v95_v23 }

</bundles_post_ra>
